<compile_context>
chip_gen: v6e
topology: v6e:2x2x1
jax: 0.10.0
libtpu: 0.0.40
codegen_flags: <defaults>
</compile_context>

<pallas_src>
import jax
import jax.numpy as jnp
from jax.experimental import pallas as pl
from jax.experimental.pallas import tpu as pltpu

TEMP = 0.66
INV_TEMP = 1.0 / TEMP


def _round_up(x, m):
    return ((x + m - 1) // m) * m


def encoder_b_kernel(labels_ref, w1_ref, b1_ref, w2_ref, b2_ref, u_ref,
                     logits_ref, sample_ref):
    """One batch tile: 2-layer MLP + Gumbel-softmax (all arrays at real widths)."""
    x = labels_ref[...]                                                   # [TB, D]

    # Linear(num_digis, num_hidden) + ReLU  (MXU matmul, f32 accumulate)
    h = jnp.dot(x, w1_ref[...], preferred_element_type=jnp.float32) + b1_ref[...]
    h = jnp.maximum(h, 0.0)                                               # [TB, H]

    # Linear(num_hidden, zShared_dim)
    logits = jnp.dot(h, w2_ref[...], preferred_element_type=jnp.float32) + b2_ref[...]
    logits_ref[...] = logits                                              # [TB, Z]

    # Concrete / Gumbel-softmax relaxation at temperature TEMP.
    eps = 1e-20
    g = -jnp.log(-jnp.log(u_ref[...] + eps) + eps)                        # Gumbel(0,1)
    z = (logits + g) * INV_TEMP
    z = z - jnp.max(z, axis=-1, keepdims=True)
    ez = jnp.exp(z)
    # Exact normalization (rows sum to 1 to f32 precision) — kernel is HBM-bound so
    # the exact divide vs. approx EUP reciprocal makes no measurable difference.
    sample_ref[...] = ez / jnp.sum(ez, axis=-1, keepdims=True)            # [TB, Z]


def encoder_b_forward(labels, params, u, *, tb=2048):
    """labels: [..., num_digis] f32; u: [..., zShared_dim] uniform(0,1) Gumbel noise.

    Returns (shared_logit [..., Z], concrete_sample [..., Z]).
    """
    D = labels.shape[-1]
    H = params["w1"].shape[1]
    Z = params["w2"].shape[1]

    lead = labels.shape[:-1]           # supports an expand_inputs-style sample dim
    labels = labels.reshape(-1, D).astype(jnp.float32)
    u = u.reshape(-1, Z).astype(jnp.float32)
    B = labels.shape[0]

    # Batch tile: multiple of 8 (sublane); cap at ceil(B/2) so there are >= 2 grid
    # tiles whenever possible (lets v7x's two TensorCores split the "parallel" axis).
    B8 = _round_up(B, 8)
    tb = max(8, _round_up(min(tb, max(8, pl.cdiv(B8, 2))), 8))
    Bp = _round_up(B, tb)
    if Bp != B:
        labels = jnp.pad(labels, ((0, Bp - B), (0, 0)))
        u = jnp.pad(u, ((0, Bp - B), (0, 0)), constant_values=0.5)

    grid = (Bp // tb,)

    in_specs = [
        pl.BlockSpec((tb, D), lambda i: (i, 0)),    # labels (tiled over batch)
        pl.BlockSpec((D, H), lambda i: (0, 0)),     # W1     (VMEM-resident)
        pl.BlockSpec((1, H), lambda i: (0, 0)),     # b1     (VMEM-resident)
        pl.BlockSpec((H, Z), lambda i: (0, 0)),     # W2     (VMEM-resident)
        pl.BlockSpec((1, Z), lambda i: (0, 0)),     # b2     (VMEM-resident)
        pl.BlockSpec((tb, Z), lambda i: (i, 0)),    # Gumbel noise (tiled over batch)
    ]
    out_specs = (
        pl.BlockSpec((tb, Z), lambda i: (i, 0)),    # logits (real width Z)
        pl.BlockSpec((tb, Z), lambda i: (i, 0)),    # sample (real width Z)
    )
    out_shape = (jax.ShapeDtypeStruct((Bp, Z), jnp.float32),
                 jax.ShapeDtypeStruct((Bp, Z), jnp.float32))

    # Advisory cost estimate so XLA can overlap this small call with neighbors.
    flops = 2 * Bp * (D * H + H * Z)
    transcendentals = 3 * Bp * Z                    # 2x log + exp per element
    bytes_accessed = 4 * (Bp * D + Bp * Z           # labels + noise in
                          + D * H + H + H * Z + Z   # weights/biases in
                          + 2 * Bp * Z)             # logits + sample out
    cost = pl.CostEstimate(flops=flops, transcendentals=transcendentals,
                           bytes_accessed=bytes_accessed)

    logits_p, sample_p = pl.pallas_call(
        encoder_b_kernel,
        out_shape=out_shape,
        grid=grid,
        in_specs=in_specs,
        out_specs=out_specs,
        compiler_params=pltpu.CompilerParams(
            dimension_semantics=("parallel",)),      # megacore / v7x 2-TC split
        cost_estimate=cost,
    )(labels, params["w1"], params["b1"], params["w2"], params["b2"], u)

    if Bp != B:                                      # skip the slice when unpadded
        logits_p = logits_p[:B]
        sample_p = sample_p[:B]
    return logits_p.reshape(lead + (Z,)), sample_p.reshape(lead + (Z,))


def init_params(key, num_digis, num_hidden, zshared_dim):
    """Deterministic init mimicking torch.nn.Linear (U(-1/sqrt(fan_in), 1/sqrt(fan_in)))."""
    k1, k2, k3, k4 = jax.random.split(key, 4)
    bound1 = 1.0 / jnp.sqrt(num_digis)
    bound2 = 1.0 / jnp.sqrt(num_hidden)
    return {
        "w1": jax.random.uniform(k1, (num_digis, num_hidden), jnp.float32, -bound1, bound1),
        "b1": jax.random.uniform(k2, (1, num_hidden), jnp.float32, -bound1, bound1),
        "w2": jax.random.uniform(k3, (num_hidden, zshared_dim), jnp.float32, -bound2, bound2),
        "b2": jax.random.uniform(k4, (1, zshared_dim), jnp.float32, -bound2, bound2),
    }


def reference_forward(labels, params, u):
    """Pure-JAX reference of the module forward + concrete sample."""
    h = jnp.maximum(labels @ params["w1"] + params["b1"], 0.0)
    logits = h @ params["w2"] + params["b2"]
    eps = 1e-20
    g = -jnp.log(-jnp.log(u + eps) + eps)
    z = (logits + g) / TEMP
    z = z - jnp.max(z, axis=-1, keepdims=True)
    ez = jnp.exp(z)
    return logits, ez / jnp.sum(ez, axis=-1, keepdims=True)


if __name__ == "__main__":
    # Small shapes consistent with the module (num_digis=10, num_hidden=256, zShared_dim=10).
    B, NUM_DIGIS, NUM_HIDDEN, ZSHARED = 64, 10, 256, 10

    key = jax.random.PRNGKey(0)
    k_param, k_label, k_noise = jax.random.split(key, 3)

    params = init_params(k_param, NUM_DIGIS, NUM_HIDDEN, ZSHARED)

    # One-hot digit labels (what EncoderB consumes), float32.
    digits = jax.random.randint(k_label, (B,), 0, NUM_DIGIS)
    labels = jax.nn.one_hot(digits, NUM_DIGIS, dtype=jnp.float32)          # [B, 10]

    # Deterministic uniform noise for the concrete (Gumbel-softmax) sample.
    # TODO(synk): probtorch.Trace / q.concrete registration is host-side bookkeeping;
    # the kernel returns the logits + relaxed sample the trace would hold.
    u = jax.random.uniform(k_noise, (B, ZSHARED), jnp.float32,
                           minval=1e-6, maxval=1.0 - 1e-6)

    shared_logit, concrete_sample = encoder_b_forward(labels, params, u)
    jax.block_until_ready((shared_logit, concrete_sample))

    assert shared_logit.shape == (B, ZSHARED)
    assert concrete_sample.shape == (B, ZSHARED)

    ref_logit, ref_sample = reference_forward(labels, params, u)
    # Exact softmax normalization in-kernel -> rows sum to 1 to f32 precision.
    assert bool(jnp.allclose(jnp.sum(concrete_sample, axis=-1), 1.0, atol=1e-4))
    assert bool(jnp.allclose(shared_logit, ref_logit, rtol=2e-3, atol=2e-3))
    assert bool(jnp.allclose(concrete_sample, ref_sample, rtol=2e-3, atol=2e-3))

    print("KERNEL_OK")
</pallas_src>

<mosaic_0001>
module attributes {stable_mosaic.version = 11 : i64} {
  func.func @encoder_b_kernel(%arg0: i32, %arg1: memref<32x10xf32, #tpu.memory_space<vmem>>, %arg2: memref<10x256xf32, #tpu.memory_space<vmem>>, %arg3: memref<1x256xf32, #tpu.memory_space<vmem>>, %arg4: memref<256x10xf32, #tpu.memory_space<vmem>>, %arg5: memref<1x10xf32, #tpu.memory_space<vmem>>, %arg6: memref<32x10xf32, #tpu.memory_space<vmem>>, %arg7: memref<32x10xf32, #tpu.memory_space<vmem>>, %arg8: memref<32x10xf32, #tpu.memory_space<vmem>>) attributes {dimension_semantics = [#tpu.dimension_semantics<parallel>], iteration_bounds = array<i64: 2>, scalar_prefetch = 0 : i64, scratch_operands = 0 : i64, tpu.core_type = #tpu.core_type<tc>, window_params = [{transform_indices = @transform_0, window_bounds = array<i64: 32, 10>}, {pipeline_mode = #tpu.pipeline_mode<synchronous>, transform_indices = @transform_1, window_bounds = array<i64: 10, 256>}, {pipeline_mode = #tpu.pipeline_mode<synchronous>, transform_indices = @transform_2, window_bounds = array<i64: 1, 256>}, {pipeline_mode = #tpu.pipeline_mode<synchronous>, transform_indices = @transform_3, window_bounds = array<i64: 256, 10>}, {pipeline_mode = #tpu.pipeline_mode<synchronous>, transform_indices = @transform_4, window_bounds = array<i64: 1, 10>}, {transform_indices = @transform_5, window_bounds = array<i64: 32, 10>}, {transform_indices = @transform_6, window_bounds = array<i64: 32, 10>}, {transform_indices = @transform_7, window_bounds = array<i64: 32, 10>}]} {
    %c0 = arith.constant 0 : index
    %c0_0 = arith.constant 0 : index
    %0 = vector.load %arg1[%c0, %c0_0] : memref<32x10xf32, #tpu.memory_space<vmem>>, vector<32x10xf32>
    %c0_1 = arith.constant 0 : index
    %c0_2 = arith.constant 0 : index
    %1 = vector.load %arg2[%c0_1, %c0_2] : memref<10x256xf32, #tpu.memory_space<vmem>>, vector<10x256xf32>
    %cst = arith.constant dense<0.000000e+00> : vector<32x256xf32>
    %2 = tpu.matmul %0, %1, %cst {dimension_numbers = #tpu.dot_dimension_numbers<[1], [0], [0], [1], [0, 0, 1, 1], [], []>} : vector<32x10xf32>, vector<10x256xf32>, vector<32x256xf32> -> vector<32x256xf32>
    %c0_3 = arith.constant 0 : index
    %c0_4 = arith.constant 0 : index
    %3 = vector.load %arg3[%c0_3, %c0_4] : memref<1x256xf32, #tpu.memory_space<vmem>>, vector<1x256xf32>
    %4 = vector.broadcast %3 : vector<1x256xf32> to vector<32x256xf32>
    %5 = arith.addf %2, %4 : vector<32x256xf32>
    %cst_5 = arith.constant 0.000000e+00 : f32
    %6 = vector.broadcast %cst_5 : f32 to vector<32x256xf32>
    %7 = arith.maximumf %5, %6 : vector<32x256xf32>
    %c0_6 = arith.constant 0 : index
    %c0_7 = arith.constant 0 : index
    %8 = vector.load %arg4[%c0_6, %c0_7] : memref<256x10xf32, #tpu.memory_space<vmem>>, vector<256x10xf32>
    %cst_8 = arith.constant dense<0.000000e+00> : vector<32x10xf32>
    %9 = tpu.matmul %7, %8, %cst_8 {dimension_numbers = #tpu.dot_dimension_numbers<[1], [0], [0], [1], [0, 0, 1, 1], [], []>} : vector<32x256xf32>, vector<256x10xf32>, vector<32x10xf32> -> vector<32x10xf32>
    %c0_9 = arith.constant 0 : index
    %c0_10 = arith.constant 0 : index
    %10 = vector.load %arg5[%c0_9, %c0_10] : memref<1x10xf32, #tpu.memory_space<vmem>>, vector<1x10xf32>
    %11 = vector.broadcast %10 : vector<1x10xf32> to vector<32x10xf32>
    %12 = arith.addf %9, %11 : vector<32x10xf32>
    %c0_11 = arith.constant 0 : index
    %c0_12 = arith.constant 0 : index
    %13 = vector.load %arg7[%c0_11, %c0_12] : memref<32x10xf32, #tpu.memory_space<vmem>>, vector<32x10xf32>
    tpu.vector_store %arg7[%c0_11, %c0_12], %12 {strides = array<i32>} : memref<32x10xf32, #tpu.memory_space<vmem>>, vector<32x10xf32>,
    %c0_13 = arith.constant 0 : index
    %c0_14 = arith.constant 0 : index
    %14 = vector.load %arg6[%c0_13, %c0_14] : memref<32x10xf32, #tpu.memory_space<vmem>>, vector<32x10xf32>
    %cst_15 = arith.constant 9.99999968E-21 : f32
    %15 = vector.broadcast %cst_15 : f32 to vector<32x10xf32>
    %16 = arith.addf %14, %15 : vector<32x10xf32>
    %17 = math.log %16 : vector<32x10xf32>
    %cst_16 = arith.constant 0.000000e+00 : f32
    %18 = vector.broadcast %cst_16 : f32 to vector<32x10xf32>
    %19 = arith.subf %18, %17 : vector<32x10xf32>
    %cst_17 = arith.constant 9.99999968E-21 : f32
    %20 = vector.broadcast %cst_17 : f32 to vector<32x10xf32>
    %21 = arith.addf %19, %20 : vector<32x10xf32>
    %22 = math.log %21 : vector<32x10xf32>
    %cst_18 = arith.constant 0.000000e+00 : f32
    %23 = vector.broadcast %cst_18 : f32 to vector<32x10xf32>
    %24 = arith.subf %23, %22 : vector<32x10xf32>
    %25 = arith.addf %12, %24 : vector<32x10xf32>
    %cst_19 = arith.constant 1.5151515 : f32
    %26 = vector.broadcast %cst_19 : f32 to vector<32x10xf32>
    %27 = arith.mulf %25, %26 : vector<32x10xf32>
    %cst_20 = arith.constant dense<0xFF800000> : vector<32xf32>
    %28 = vector.multi_reduction <maximumf>, %27, %cst_20 [1] : vector<32x10xf32> to vector<32xf32>
    %29 = vector.shape_cast %28 : vector<32xf32> to vector<32x1xf32>
    %30 = vector.broadcast %29 : vector<32x1xf32> to vector<32x10xf32>
    %31 = arith.subf %27, %30 : vector<32x10xf32>
    %32 = math.exp %31 : vector<32x10xf32>
    %cst_21 = arith.constant dense<0.000000e+00> : vector<32xf32>
    %33 = vector.multi_reduction <add>, %32, %cst_21 [1] : vector<32x10xf32> to vector<32xf32>
    %34 = vector.shape_cast %33 : vector<32xf32> to vector<32x1xf32>
    %35 = vector.broadcast %34 : vector<32x1xf32> to vector<32x10xf32>
    %36 = arith.divf %32, %35 : vector<32x10xf32>
    %c0_22 = arith.constant 0 : index
    %c0_23 = arith.constant 0 : index
    %37 = vector.load %arg8[%c0_22, %c0_23] : memref<32x10xf32, #tpu.memory_space<vmem>>, vector<32x10xf32>
    tpu.vector_store %arg8[%c0_22, %c0_23], %36 {strides = array<i32>} : memref<32x10xf32, #tpu.memory_space<vmem>>, vector<32x10xf32>,
    return
  }
  func.func @transform_0(%arg0: i32) -> (i32, i32) {
    %c0_i32 = arith.constant 0 : i32
    %c0_i32_0 = arith.constant 0 : i32
    return %arg0, %c0_i32 : i32, i32
  }
  func.func @transform_1(%arg0: i32) -> (i32, i32) {
    %c0_i32 = arith.constant 0 : i32
    %c0_i32_0 = arith.constant 0 : i32
    %c0_i32_1 = arith.constant 0 : i32
    return %c0_i32, %c0_i32_0 : i32, i32
  }
  func.func @transform_2(%arg0: i32) -> (i32, i32) {
    %c0_i32 = arith.constant 0 : i32
    %c0_i32_0 = arith.constant 0 : i32
    %c0_i32_1 = arith.constant 0 : i32
    return %c0_i32, %c0_i32_0 : i32, i32
  }
  func.func @transform_3(%arg0: i32) -> (i32, i32) {
    %c0_i32 = arith.constant 0 : i32
    %c0_i32_0 = arith.constant 0 : i32
    %c0_i32_1 = arith.constant 0 : i32
    return %c0_i32, %c0_i32_0 : i32, i32
  }
  func.func @transform_4(%arg0: i32) -> (i32, i32) {
    %c0_i32 = arith.constant 0 : i32
    %c0_i32_0 = arith.constant 0 : i32
    %c0_i32_1 = arith.constant 0 : i32
    return %c0_i32, %c0_i32_0 : i32, i32
  }
  func.func @transform_5(%arg0: i32) -> (i32, i32) {
    %c0_i32 = arith.constant 0 : i32
    %c0_i32_0 = arith.constant 0 : i32
    return %arg0, %c0_i32 : i32, i32
  }
  func.func @transform_6(%arg0: i32) -> (i32, i32) {
    %c0_i32 = arith.constant 0 : i32
    %c0_i32_0 = arith.constant 0 : i32
    return %arg0, %c0_i32 : i32, i32
  }
  func.func @transform_7(%arg0: i32) -> (i32, i32) {
    %c0_i32 = arith.constant 0 : i32
    %c0_i32_0 = arith.constant 0 : i32
    return %arg0, %c0_i32 : i32, i32
  }
}

</mosaic_0001>

<bundles_post_ra>
// kernel: tpu_custom_call.1
= control target key start
LH: loop header
LB: loop body
LE: loop exit
PB: predicated region body
PF: predicated region fallthrough
CT: control target
= control target key end

     0   :  { %s965_s24 = smov 0   ;;  %s1140_s0 = inlined_call_operand.vmem [shape: f32[64,10], index: 0, kind: input, shape index: {}]   ;;  %s1141_s1 = inlined_call_operand.vmem [shape: f32[10,256], index: 1, kind: input, shape index: {}]   ;;  %s1142_s2 = inlined_call_operand.vmem [shape: f32[1,256], index: 2, kind: input, shape index: {}]   ;;  %s1143_s3 = inlined_call_operand.vmem [shape: f32[256,10], index: 3, kind: input, shape index: {}]   ;;  %s1144_s4 = inlined_call_operand.vmem [shape: f32[1,10], index: 4, kind: input, shape index: {}]   ;;  %s1145_s5 = inlined_call_operand.vmem [shape: f32[64,10], index: 5, kind: input, shape index: {}]   ;;  %s1146_s6 = inlined_call_operand.vmem [shape: f32[64,10], index: 6, kind: output, shape index: {0}]   ;;  %s1147_s7 = inlined_call_operand.vmem [shape: f32[64,10], index: 7, kind: output, shape index: {1}]  }
   0x1 LB: > { %s777_s25 = sadd.s32 4294967295, %s922_s24   ;;  %p781_p0 = scmp.ge.s32.totalorder %s922_s24, 1  ;;  %s922_s24 = sphi %s965_s24, %s18_s24  }
   0x2   : > { %p252_p1 = scmp.lt.s32.totalorder %s922_s24, 3 }
   0x4   : > { %p253_p2 = pnand %p781_p0, %p252_p1 }
   0x5   : > { %s782_s11 = sshll.u32 (!%p253_p2), %s777_s25, 2 }
   0x6   : > { %256 = sbr.rel (%p253_p2) target bundleno = 747 (0x2eb), region = 44  ;;  %p295_p3 = scmp.lt.s32.totalorder (!%p253_p2), %s782_s11, 7 }
   0xb   : > { %v325_v0 = vld [vmem:[%s1141_s1 + $0x18] sm:$0x3]  ;;  %vm351_vm0 = vcmask 1041408   ;;  %v324_v1 = vld [vmem:[%s1141_s1 + $0x10] sm:$0x3]  ;;  %v323_v2 = vld [vmem:[%s1141_s1 + $0x8] sm:$0xff]  ;;  %v328_v41 = vlaneseq }
   0xc   : > { %790 = vmatprep.subr.msk.mxu0 %vm351_vm0, %v325_v0  ;;  %v322_v3 = vld [vmem:[%s1141_s1] sm:$0xff]  ;;  %v924_v4 = vmov 0.0   ;;  %v486_v5 = vld [vmem:[%s1143_s3 + $0xf8] sm:$0xff]  ;;  %s1149_s11 = smov (!%p295_p3, %s782_s11), 7  ;;  %v485_v7 = vld [vmem:[%s1143_s3 + $0xf0] sm:$0xff]  ;;  %vm338_vm1 = vcmask 80896  }
   0xd   : > { %791 = vmatpush1.msk.msra.mxu0 %vm351_vm0, %v324_v1  ;;  %422 = vmatprep.mubr.f32.mxu0 %v924_v4  ;;  %v470_v6 = vld [vmem:[%s1143_s3 + $0x78] sm:$0xff]  ;;  %v469_v8 = vld [vmem:[%s1143_s3 + $0x70] sm:$0xff]  ;;  %s997_s20 = sshll.u32 %s1149_s11, 3  ;;  %v484_v9 = vld [vmem:[%s1143_s3 + $0xe8] sm:$0xff]  ;;  %v329_v42 = vshrl.u32 %v328_v41, 7 }
   0xe   : > { %388 = vmatprep.subr.mxu0 %v323_v2  ;;  %843 = vmatprep.subr.mxu1 %v486_v5  ;;  %s1006_s26 = scalar_lea.vmem %s1140_s0, %s997_s20  ;;  %v468_v10 = vld [vmem:[%s1143_s3 + $0x68] sm:$0xff]  ;;  %v483_v12 = vld [vmem:[%s1143_s3 + $0xe0] sm:$0xff]  ;;  %v482_v15 = vld [vmem:[%s1143_s3 + $0xd8] sm:$0xff]  ;;  %s304_s21 = scalar_lea.vmem %s1145_s5, %s997_s20 }
   0xf   : > { %389 = vmatpush1.msra.mxu0 %v322_v3  ;;  %859 = vmatpush3.msra.mxu1 %v470_v6  ;;  %v318_v11 = vld [vmem:[%s1006_s26] sm:$0xff]  ;;  %v319_v13 = vld [vmem:[%s1006_s26 + $0x8] sm:$0xff]  ;;  %v320_v16 = vld [vmem:[%s1006_s26 + $0x10] sm:$0xff]  ;;  %v330_v43 = vsub.s32 0, %v329_v42  ;;  %v334_v45 = vsub.s32 1, %v329_v42  ;;  %s1111_s27 = scalar_lea.vmem %s1146_s6, %s997_s20  ;;  %s316_s30 = scalar_lea.vmem %s1147_s7, %s997_s20 }
  0x10   : > { %799 = vmatprep.subr.mxu0 %v486_v5  ;;  %844 = vmatprep.subr.mxu1 %v485_v7  ;;  %v467_v14 = vld [vmem:[%s1143_s3 + $0x60] sm:$0xff]  ;;  %v466_v17 = vld [vmem:[%s1143_s3 + $0x58] sm:$0xff]  ;;  %v481_v18 = vld [vmem:[%s1143_s3 + $0xd0] sm:$0xff] }
  0x11   : > { %860 = vmatpush3.msra.mxu1 %v469_v8  ;;  %792 = vmatmul.mubr.msk.f32.vlgmr.msra.gmra.mxu0 %vm338_vm1, %v318_v11  ;;  %v465_v19 = vld [vmem:[%s1143_s3 + $0x50] sm:$0xff]  ;;  %v321_v20 = vld [vmem:[%s1006_s26 + $0x18] sm:$0xff]  ;;  %v480_v21 = vld [vmem:[%s1143_s3 + $0xc8] sm:$0xff] }
  0x12   : > { %845 = vmatprep.subr.mxu1 %v484_v9  ;;  %428 = vmatprep.mubr.f32.mxu0 %v924_v4  ;;  %v464_v22 = vld [vmem:[%s1143_s3 + $0x48] sm:$0xff]  ;;  %v479_v23 = vld [vmem:[%s1143_s3 + $0xc0] sm:$0xff]  ;;  %v478_v25 = vld [vmem:[%s1143_s3 + $0xb8] sm:$0xff] }
  0x13   : > { %861 = vmatpush3.msra.mxu1 %v468_v10  ;;  %800 = vmatpush3.msra.mxu0 %v470_v6  ;;  %v463_v24 = vld [vmem:[%s1143_s3 + $0x40] sm:$0xff]  ;;  %v462_v26 = vld [vmem:[%s1143_s3 + $0x38] sm:$0xff]  ;;  %v477_v27 = vld [vmem:[%s1143_s3 + $0xb0] sm:$0xff] }
  0x14   : > { %846 = vmatprep.subr.mxu1 %v483_v12  ;;  %801 = vmatprep.subr.mxu0 %v485_v7  ;;  %v461_v28 = vld [vmem:[%s1143_s3 + $0x30] sm:$0xff]  ;;  %v476_v29 = vld [vmem:[%s1143_s3 + $0xa8] sm:$0xff]  ;;  %v475_v31 = vld [vmem:[%s1143_s3 + $0xa0] sm:$0xff] }
  0x15   : > { %862 = vmatpush3.msra.mxu1 %v467_v14  ;;  %802 = vmatpush3.msra.mxu0 %v469_v8  ;;  %v460_v30 = vld [vmem:[%s1143_s3 + $0x28] sm:$0xff]  ;;  %v459_v32 = vld [vmem:[%s1143_s3 + $0x20] sm:$0xff]  ;;  %v474_v33 = vld [vmem:[%s1143_s3 + $0x98] sm:$0xff] }
  0x16   : > { %847 = vmatprep.subr.mxu1 %v482_v15  ;;  %793 = vmatmul.mubr.msk.f32.gmra.mxu0 %vm338_vm1, %v319_v13  ;;  %v458_v34 = vld [vmem:[%s1143_s3 + $0x18] sm:$0xff]  ;;  %v473_v35 = vld [vmem:[%s1143_s3 + $0x90] sm:$0xff]  ;;  %v472_v37 = vld [vmem:[%s1143_s3 + $0x88] sm:$0xff] }
  0x17   : > { %803 = vmatprep.subr.mxu0 %v484_v9  ;;  %434 = vmatprep.mubr.f32.mxu0 %v924_v4  ;;  %v457_v36 = vld [vmem:[%s1143_s3 + $0x10] sm:$0xff]  ;;  %v456_v38 = vld [vmem:[%s1143_s3 + $0x8] sm:$0xff]  ;;  %v471_v39 = vld [vmem:[%s1143_s3 + $0x80] sm:$0xff] }
  0x18   : > { %804 = vmatpush3.msra.mxu0 %v468_v10  ;;  %863 = vmatpush3.msra.mxu1 %v466_v17  ;;  %v455_v40 = vld [vmem:[%s1143_s3] sm:$0xff]  ;;  %v584_v10 = vld [vmem:[%s304_s21 + $0x8] sm:$0xff] }
  0x19   : > { %805 = vmatprep.subr.mxu0 %v483_v12  ;;  %848 = vmatprep.subr.mxu1 %v481_v18  ;;  %v326_v44 = vld [vmem:[%s1142_s2] sm:$0x3]  ;;  %v588_v11 = vadd.f32 1e-20, %v584_v10  ;;  %v585_v12 = vld [vmem:[%s304_s21 + $0x10] sm:$0xff] }
  0x1a   : > { %806 = vmatpush3.msra.mxu0 %v467_v14  ;;  %864 = vmatpush3.msra.mxu1 %v465_v19  ;;  %v331_v46 = vrot.slane %v326_v44, %v330_v43  ;;  %v335_v47 = vrot.slane %v326_v44, %v334_v45  ;;  %v583_v8 = vld [vmem:[%s304_s21] sm:$0xff]  ;;  %v589_v13 = vadd.f32 1e-20, %v585_v12  ;;  %v586_v14 = vld [vmem:[%s304_s21 + $0x18] sm:$0xff] }
  0x1b   : > { %794 = vmatmul.mubr.msk.f32.gmra.mxu0 %vm338_vm1, %v320_v16  ;;  %807 = vmatprep.subr.mxu0 %v482_v15  ;;  %v587_v9 = vadd.f32 1e-20, %v583_v8  ;;  %v590_v15 = vadd.f32 1e-20, %v586_v14 }
  0x1c   : > { %440 = vmatprep.mubr.f32.mxu0 %v924_v4  ;;  %808 = vmatpush3.msra.mxu0 %v466_v17 }
  0x1d   : > { %809 = vmatprep.subr.mxu0 %v481_v18  ;;  %849 = vmatprep.subr.mxu1 %v480_v21  ;;  %884 = vlog2.f32 %v587_v9 }
  0x1e   : > { %810 = vmatpush3.msra.mxu0 %v465_v19  ;;  %865 = vmatpush3.msra.mxu1 %v464_v22  ;;  %886 = vlog2.f32 %v588_v11 }
  0x1f   : > { %795 = vmatmul.mubr.msk.f32.gmra.mxu0 %vm338_vm1, %v321_v20  ;;  %811 = vmatprep.subr.mxu0 %v480_v21  ;;  %888 = vlog2.f32 %v589_v13 }
  0x20   : > { %812 = vmatpush3.msra.mxu0 %v464_v22  ;;  %850 = vmatprep.subr.mxu1 %v479_v23  ;;  %890 = vlog2.f32 %v590_v15 }
  0x21   : > { %813 = vmatprep.subr.mxu0 %v479_v23  ;;  %866 = vmatpush3.msra.mxu1 %v463_v24 }
  0x22   : > { %814 = vmatpush3.msra.mxu0 %v463_v24  ;;  %851 = vmatprep.subr.mxu1 %v478_v25 }
  0x23   : > { %815 = vmatprep.subr.mxu0 %v478_v25  ;;  %867 = vmatpush3.msra.mxu1 %v462_v26 }
  0x24   : > { %816 = vmatpush3.msra.mxu0 %v462_v26  ;;  %852 = vmatprep.subr.mxu1 %v477_v27 }
  0x25   : > { %817 = vmatprep.subr.mxu0 %v477_v27  ;;  %868 = vmatpush3.msra.mxu1 %v461_v28 }
  0x26   : > { %818 = vmatpush3.msra.mxu0 %v461_v28  ;;  %853 = vmatprep.subr.mxu1 %v476_v29 }
  0x27   : > { %819 = vmatprep.subr.mxu0 %v476_v29  ;;  %869 = vmatpush3.msra.mxu1 %v460_v30 }
  0x28   : > { %820 = vmatpush3.msra.mxu0 %v460_v30  ;;  %854 = vmatprep.subr.mxu1 %v475_v31 }
  0x29   : > { %821 = vmatprep.subr.mxu0 %v475_v31  ;;  %870 = vmatpush3.msra.mxu1 %v459_v32 }
  0x2a   : > { %822 = vmatpush3.msra.mxu0 %v459_v32  ;;  %855 = vmatprep.subr.mxu1 %v474_v33  ;;  %v885_v16 = vpop.eup %884 }
  0x2b   : > { %823 = vmatprep.subr.mxu0 %v474_v33  ;;  %871 = vmatpush3.msra.mxu1 %v458_v34  ;;  %v592_v17 = vmul.f32 0.6931472, %v885_v16  ;;  %v887_v18 = vpop.eup %886 }
  0x2c   : > { %824 = vmatpush3.msra.mxu0 %v458_v34  ;;  %856 = vmatprep.subr.mxu1 %v473_v35  ;;  %v889_v19 = vpop.eup %888  ;;  %v594_v21 = vmul.f32 0.6931472, %v887_v18 }
  0x2d   : > { %825 = vmatprep.subr.mxu0 %v473_v35  ;;  %872 = vmatpush3.msra.mxu1 %v457_v36  ;;  %v599_v20 = vsub.f32 0.0, %v592_v17  ;;  %v596_v22 = vmul.f32 0.6931472, %v889_v19  ;;  %v891_v25 = vpop.eup %890 }
  0x2e   : > { %826 = vmatpush3.msra.mxu0 %v457_v36  ;;  %857 = vmatprep.subr.mxu1 %v472_v37  ;;  %v600_v24 = vsub.f32 0.0, %v594_v21  ;;  %v598_v28 = vmul.f32 0.6931472, %v891_v25  ;;  %v796_v36 = vld [vmem:[%s1144_s4] ss:$0 sm:$0xff] }
  0x2f   : > { %827 = vmatprep.subr.mxu0 %v472_v37  ;;  %873 = vmatpush3.msra.mxu1 %v456_v38  ;;  %v603_v23 = vadd.f32 1e-20, %v599_v20  ;;  %v601_v26 = vsub.f32 0.0, %v596_v22 }
  0x30   : > { %828 = vmatpush3.msra.mxu0 %v456_v38  ;;  %858 = vmatprep.subr.mxu1 %v471_v39  ;;  %v604_v27 = vadd.f32 1e-20, %v600_v24  ;;  %v602_v30 = vsub.f32 0.0, %v598_v28 }
  0x31   : > { %829 = vmatprep.subr.mxu0 %v471_v39  ;;  %874 = vmatpush3.msra.mxu1 %v455_v40  ;;  %892 = vlog2.f32 %v603_v23  ;;  %v605_v29 = vadd.f32 1e-20, %v601_v26 }
  0x32   : > { %830 = vmatpush3.msra.mxu0 %v455_v40  ;;  %894 = vlog2.f32 %v604_v27  ;;  %v606_v31 = vadd.f32 1e-20, %v602_v30 }
  0x33   : > { %896 = vlog2.f32 %v605_v29 }
  0x34   : > { %898 = vlog2.f32 %v606_v31 }
  0x3e   : > { %v893_v32 = vpop.eup %892 }
  0x3f   : > { %v608_v33 = vmul.f32 0.6931472, %v893_v32  ;;  %v895_v34 = vpop.eup %894 }
  0x40   : > { %v897_v38 = vpop.eup %896  ;;  %v610_v41 = vmul.f32 0.6931472, %v895_v34 }
  0x41   : > { %v615_v40 = vsub.f32 0.0, %v608_v33  ;;  %v612_v45 = vmul.f32 0.6931472, %v897_v38 }
  0xd1   : > { %v424_v48 = vpop.f32.mrf.mxu0 }
  0xd2   : > { %v425_v49 = vadd.f32 %v424_v48, %v331_v46  ;;  %v616_v48 = vsub.f32 0.0, %v610_v41 }
  0xd3   : > { %v426_v50 = vpop.f32.mrf.mxu0 }
  0xd4   : > { %v427_v51 = vadd.f32 %v426_v50, %v335_v47  ;;  %v447_v54 = vmax.f32 %v425_v49, 0.0  ;;  %v899_v49 = vpop.eup %898 }
  0xd6   : > { %v430_v52 = vpop.f32.mrf.mxu0  ;;  %v448_v53 = vmax.f32 %v427_v51, 0.0 }
  0xd7   : > { %v431_v55 = vadd.f32 %v430_v52, %v331_v46 }
  0xd8   : > { %v432_v56 = vpop.f32.mrf.mxu0  ;;  %558 = vmatprep.mubr.f32.mxu0 %v448_v53 }
  0xd9   : > { %v433_v57 = vadd.f32 %v432_v56, %v335_v47  ;;  %559 = vmatmul.mubr.f32.vlgmr.msra.gmra.mxu0 %v447_v54  ;;  %v449_v60 = vmax.f32 %v431_v55, 0.0  ;;  %v617_v54 = vsub.f32 0.0, %v612_v45 }
  0xdb   : > { %v436_v58 = vpop.f32.mrf.mxu0  ;;  %v450_v59 = vmax.f32 %v433_v57, 0.0 }
  0xdc   : > { %v437_v61 = vadd.f32 %v436_v58, %v331_v46  ;;  %v614_v58 = vmul.f32 0.6931472, %v899_v49 }
  0xdd   : > { %v438_v62 = vpop.f32.mrf.mxu0  ;;  %563 = vmatprep.mubr.f32.mxu1 %v450_v59 }
  0xde   : > { %v439_v63 = vadd.f32 %v438_v62, %v335_v47  ;;  %564 = vmatmul.mubr.f32.vlgmr.msra.gmra.mxu1 %v449_v60  ;;  %v451_v2 = vmax.f32 %v437_v61, 0.0 }
  0xdf   : > { %v442_v0 = vpop.f32.mrf.mxu0 }
  0xe0   : > { %v452_v1 = vmax.f32 %v439_v63, 0.0  ;;  %v443_v3 = vadd.f32 %v442_v0, %v331_v46 }
  0xe1   : > { %v444_v4 = vpop.f32.mrf.mxu0 }
  0xe2   : > { %v445_v5 = vadd.f32 %v444_v4, %v335_v47  ;;  %568 = vmatprep.mubr.f32.mxu1 %v452_v1  ;;  %v453_v7 = vmax.f32 %v443_v3, 0.0 }
  0xe3   : > { %569 = vmatmul.mubr.f32.gmra.mxu1 %v451_v2  ;;  %v618_v2 = vsub.f32 0.0, %v614_v58 }
  0xe4   : > { %v454_v6 = vmax.f32 %v445_v5, 0.0 }
  0xe6   : > { %573 = vmatprep.mubr.f32.mxu1 %v454_v6 }
  0xe7   : > { %574 = vmatmul.mubr.f32.gmra.mxu1 %v453_v7 }
 0x199   : > { %v831_v35 = vpop.f32.mrf.mxu0 }
 0x19b   : > { %v832_v37 = vpop.f32.mrf.mxu0 }
 0x19c   : > { %v833_v39 = vadd.f32 %v832_v37, %v831_v35 }
 0x19e   : > { %v834_v42 = vpop.f32.mrf.mxu1  ;;  %v561_v43 = vadd.f32 %v833_v39, %v796_v36 }
 0x1a0   : > { %v835_v44 = vpop.f32.mrf.mxu1  ;;  %579 = vst.msk [vmem:[%s1111_s27] sm:$0xff] %vm338_vm1, %v561_v43  ;;  %v619_v47 = vadd.f32 %v615_v40, %v561_v43 }
 0x1a1   : > { %v836_v46 = vadd.f32 %v835_v44, %v834_v42 }
 0x1a2   : > { %v623_v52 = vmul.f32 1.5151515, %v619_v47 }
 0x1a3   : > { %v837_v50 = vpop.f32.mrf.mxu1  ;;  %v566_v51 = vadd.f32 %v836_v46, %v796_v36 }
 0x1a4   : > { %v627_v56 = vsel %vm338_vm1, %v623_v52, -inf }
 0x1a5   : > { %v838_v53 = vpop.f32.mrf.mxu1  ;;  %580 = vst.msk [vmem:[%s1111_s27 + $0x8] sm:$0xff] %vm338_vm1, %v566_v51  ;;  %v620_v57 = vadd.f32 %v616_v48, %v566_v51  ;;  %628 = vmax.xlane.f32.xlu0 %v627_v56 }
 0x1a6   : > { %v839_v55 = vadd.f32 %v838_v53, %v837_v50 }
 0x1a7   : > { %v840_v59 = vpop.f32.mrf.mxu1  ;;  %v624_v61 = vmul.f32 1.5151515, %v620_v57 }
 0x1a8   : > { %v571_v60 = vadd.f32 %v839_v55, %v796_v36 }
 0x1a9   : > { %v841_v62 = vpop.f32.mrf.mxu1  ;;  %v630_v0 = vsel %vm338_vm1, %v624_v61, -inf }
 0x1aa   : > { %581 = vst.msk [vmem:[%s1111_s27 + $0x10] sm:$0xff] %vm338_vm1, %v571_v60  ;;  %v842_v63 = vadd.f32 %v841_v62, %v840_v59  ;;  %v621_v1 = vadd.f32 %v617_v54, %v571_v60  ;;  %631 = vmax.xlane.f32.xlu0 %v630_v0 }
 0x1ac   : > { %v576_v3 = vadd.f32 %v842_v63, %v796_v36  ;;  %v625_v4 = vmul.f32 1.5151515, %v621_v1 }
 0x1ae   : > { %582 = vst.msk [vmem:[%s1111_s27 + $0x18] sm:$0xff] %vm338_vm1, %v576_v3  ;;  %v633_v5 = vsel %vm338_vm1, %v625_v4, -inf  ;;  %v622_v6 = vadd.f32 %v618_v2, %v576_v3 }
 0x1af   : > { %634 = vmax.xlane.f32.xlu1 %v633_v5 }
 0x1b0   : > { %v626_v7 = vmul.f32 1.5151515, %v622_v6 }
 0x1b2   : > { %v636_v8 = vsel %vm338_vm1, %v626_v7, -inf }
 0x1b3   : > { %637 = vmax.xlane.f32.xlu1 %v636_v8 }
 0x22e   : > { %v629_v9 = vpop.xlane.xlu0 %628 }
 0x22f   : > { %v639_v10 = vsub.f32 %v623_v52, %v629_v9 }
 0x231   : > { %v643_v11 = vmul.f32 1.442695, %v639_v10 }
 0x233   : > { %v632_v12 = vpop.xlane.xlu0 %631  ;;  %900 = vpow2.f32 %v643_v11 }
 0x234   : > { %v640_v13 = vsub.f32 %v624_v61, %v632_v12 }
 0x236   : > { %v645_v14 = vmul.f32 1.442695, %v640_v13 }
 0x238   : > { %v635_v15 = vpop.xlane.xlu1 %634  ;;  %902 = vpow2.f32 %v645_v14 }
 0x239   : > { %v641_v16 = vsub.f32 %v625_v4, %v635_v15 }
 0x23b   : > { %v647_v17 = vmul.f32 1.442695, %v641_v16 }
 0x23c   : > { %v638_v18 = vpop.xlane.xlu1 %637 }
 0x23d   : > { %904 = vpow2.f32 %v647_v17  ;;  %v642_v19 = vsub.f32 %v626_v7, %v638_v18 }
 0x23f   : > { %v649_v20 = vmul.f32 1.442695, %v642_v19 }
 0x240   : > { %v901_v21 = vpop.eup %900 }
 0x241   : > { %906 = vpow2.f32 %v649_v20  ;;  %v651_v22 = vsel %vm338_vm1, %v901_v21, 0.0 }
 0x242   : > { %652 = vadd.xlane.f32.xlu0 %v651_v22 }
 0x245   : > { %v903_v23 = vpop.eup %902 }
 0x246   : > { %v654_v24 = vsel %vm338_vm1, %v903_v23, 0.0 }
 0x247   : > { %655 = vadd.xlane.f32.xlu1 %v654_v24 }
 0x24a   : > { %v905_v25 = vpop.eup %904 }
 0x24b   : > { %v657_v26 = vsel %vm338_vm1, %v905_v25, 0.0 }
 0x24c   : > { %658 = vadd.xlane.f32.xlu0 %v657_v26 }
 0x24e   : > { %v907_v27 = vpop.eup %906 }
 0x24f   : > { %v660_v28 = vsel %vm338_vm1, %v907_v27, 0.0 }
 0x250   : > { %661 = vadd.xlane.f32.xlu1 %v660_v28 }
 0x2cb   : > { %v653_v29 = vpop.xlane.xlu0 %652 }
 0x2cc   : > { %908 = vrcp.f32 %v653_v29 }
 0x2d0   : > { %v656_v30 = vpop.xlane.xlu1 %655 }
 0x2d1   : > { %910 = vrcp.f32 %v656_v30 }
 0x2d5   : > { %v659_v31 = vpop.xlane.xlu0 %658 }
 0x2d6   : > { %912 = vrcp.f32 %v659_v31 }
 0x2d9   : > { %v662_v32 = vpop.xlane.xlu1 %661  ;;  %v909_v33 = vpop.eup %908 }
 0x2da   : > { %914 = vrcp.f32 %v662_v32  ;;  %v664_v34 = vmul.f32 %v909_v33, %v901_v21 }
 0x2dc   : > { %671 = vst.msk [vmem:[%s316_s30] sm:$0xff] %vm338_vm1, %v664_v34 }
 0x2de   : > { %v911_v35 = vpop.eup %910 }
 0x2df   : > { %v666_v36 = vmul.f32 %v911_v35, %v903_v23 }
 0x2e1   : > { %672 = vst.msk [vmem:[%s316_s30 + $0x8] sm:$0xff] %vm338_vm1, %v666_v36 }
 0x2e3   : > { %v913_v37 = vpop.eup %912 }
 0x2e4   : > { %v668_v38 = vmul.f32 %v913_v37, %v905_v25 }
 0x2e6   : > { %673 = vst.msk [vmem:[%s316_s30 + $0x10] sm:$0xff] %vm338_vm1, %v668_v38 }
 0x2e7   : > { %v915_v39 = vpop.eup %914 }
 0x2e8   : > { %v670_v40 = vmul.f32 %v915_v39, %v907_v27 }
 0x2ea   : > { %674 = vst.msk [vmem:[%s316_s30 + $0x18] sm:$0xff] %vm338_vm1, %v670_v40 }
 0x2eb PF: > { %s18_s24 = sadd.s32 1, %s922_s24  }
 0x2ec   : > { %p15_p4 = scmp.ge.s32.totalorder %s18_s24, 4  }
 0x2ee   :  { %17 = sbr.rel (!%p15_p4) target bundleno = 1 (0x1), region = 89 }

</bundles_post_ra>
